<compile_context>
chip_gen: v6e
topology: v6e:2x2x1
jax: 0.10.0
libtpu: 0.0.40
codegen_flags: <defaults>
</compile_context>

<pallas_src>
import jax
import jax.numpy as jnp
from jax.experimental import pallas as pl
from jax.experimental.pallas import tpu as pltpu


def _round_up(x: int, m: int) -> int:
    return (x + m - 1) // m * m


def _pad2d(a, rows, cols):
    r, c = a.shape
    if r == rows and c == cols:
        return a
    return jnp.pad(a, ((0, rows - r), (0, cols - c)))


def _vmem_capacity_bytes() -> int:
    try:
        return int(pltpu.get_tpu_info().vmem_capacity_bytes)
    except Exception:
        return 64 * 1024 * 1024  # conservative default (v7x per-core VMEM)


def _make_kernel(compute_dtype):
    cd = jnp.dtype(compute_dtype)

    def kernel(x1_ref, x2_ref, w1a_ref, w1b_ref, b1_ref, w2_ref, b2_ref, o_ref):
        # x1_ref: (tb, d1) native   x2_ref: (tb, d2) native
        # w1a_ref: (d1, d3p) cd     w1b_ref: (d2, d3p) cd   b1_ref: (1, d3p) f32
        # w2_ref:  (d3p, d4) cd                             b2_ref: (1, d4)  f32
        # Cast on the VPU (free filler slot); fused "concat" = two matmuls over
        # the split K dimension, summed in f32.
        h = jnp.dot(x1_ref[...].astype(cd), w1a_ref[...],
                    preferred_element_type=jnp.float32)
        h = h + jnp.dot(x2_ref[...].astype(cd), w1b_ref[...],
                        preferred_element_type=jnp.float32)
        h = jnp.maximum(h + b1_ref[...], 0.0)                    # bias + ReLU in f32
        out = jnp.dot(h.astype(cd), w2_ref[...],
                      preferred_element_type=jnp.float32)
        o_ref[...] = (out + b2_ref[...]).astype(o_ref.dtype)

    return kernel


def _choose_tile_b(B, d1, d2, d3p, d4, in_bytes, cd_bytes, out_bytes, budget):
    # Resident weights/biases, single-buffered (pl.Buffered(1)).
    static = cd_bytes * ((d1 + d2) * d3p + d3p * d4) + 4 * (d3p + 128)
    # Per batch-row: double-buffered native-dtype input tiles + output tile,
    # casted activations, and f32 temporaries (h / out).
    per_row = (2 * in_bytes * (d1 + d2)
               + 2 * out_bytes * d4
               + cd_bytes * (d1 + d2)
               + 4 * (d3p + d4))
    avail = max(budget - static, 0)
    t = int(min(max(avail // max(per_row, 1), 256), 2048))
    t = (t // 256) * 256  # MXU-M aligned (multiple of 256 covers v5e/v6e/v7x)
    if t >= B:
        if B >= 512:
            # Keep >=2 grid steps so dimension_semantics=("parallel",) can
            # shard across v7x's two TensorCores; near-free on 1-TC chips.
            t = _round_up((B + 1) // 2, 256)
        else:
            t = B  # whole (small) batch in one step; full-dim block is legal
    return t


def merge_layer_forward(x1, x2, w1, b1, w2, b2, *, tile_b=None,
                        compute_dtype=jnp.bfloat16, out_dtype=None):
    B, d1 = x1.shape
    Bx, d2 = x2.shape
    assert B == Bx, "x1/x2 batch mismatch"
    din, d3 = w1.shape
    assert din == d1 + d2, "w1 must be [dim1+dim2, dim3] (pre-transposed)"
    d3b, d4 = w2.shape
    assert d3b == d3, "w2 must be [dim3, dim4] (pre-transposed)"
    out_dtype = out_dtype or x1.dtype

    cd = jnp.dtype(compute_dtype)
    in_bytes = x1.dtype.itemsize            # inputs DMA'd in their native dtype
    cd_bytes = cd.itemsize
    out_bytes = jnp.dtype(out_dtype).itemsize

    # Generation-aware VMEM budget (v7x: 64 MiB physical; v5e/v6e: 128 MiB).
    capacity = _vmem_capacity_bytes()
    small_vmem = capacity <= 64 * 1024 * 1024
    budget = (24 << 20) if small_vmem else (80 << 20)
    cap = (48 << 20) if small_vmem else (100 << 20)

    # --- parameters: split W1 (fuses the concat), pad hidden dim to 128 lanes.
    # d4 stays unpadded: tiny output widths would otherwise pay 16x writeback
    # plus a post-kernel slice copy.
    d3p = _round_up(d3, 128)
    w1a = _pad2d(w1[:d1], d1, d3p).astype(cd)
    w1b = _pad2d(w1[d1:], d2, d3p).astype(cd)
    w2p = _pad2d(w2, d3p, d4).astype(cd)
    b1p = _pad2d(b1.reshape(1, -1), 1, d3p).astype(jnp.float32)
    b2p = b2.reshape(1, -1).astype(jnp.float32)

    static_bytes = cd_bytes * ((d1 + d2) * d3p + d3p * d4)
    if static_bytes > cap:
        # TODO(synk): tile d3/d4 with an inner "arbitrary" reduction axis and a
        # f32 VMEM accumulator instead of requiring full weight residency.
        raise ValueError(
            f"MergeLayer weights ({static_bytes / 2**20:.1f} MiB in {cd}) exceed "
            f"the VMEM budget ({cap / 2**20:.0f} MiB); hidden-dim tiling is not "
            f"implemented yet.")

    # --- batch tiling: no padding / casting copies; ragged last block is masked.
    if tile_b is None:
        tile_b = _choose_tile_b(B, d1, d2, d3p, d4, in_bytes, cd_bytes,
                                out_bytes, budget)
    else:
        tile_b = max(int(tile_b), 8)
        if tile_b >= B:
            tile_b = B
        elif tile_b % 8:
            tile_b = min(_round_up(tile_b, 8), B)

    grid = (pl.cdiv(B, tile_b),)

    est = (static_bytes + 4 * (d3p + 128)
           + 2 * in_bytes * tile_b * (d1 + d2)
           + 2 * out_bytes * tile_b * d4
           + cd_bytes * tile_b * (d1 + d2)
           + 4 * tile_b * (d3p + d4))
    vmem_limit = int(min(max(int(1.5 * est), 16 << 20), cap))

    kernel = _make_kernel(cd)

    def _run(single_buffer_weights: bool):
        # Constant index_maps keep weights resident; Buffered(1) additionally
        # single-buffers them (frees VMEM -> larger batch tiles).
        res_kw = {"pipeline_mode": pl.Buffered(1)} if single_buffer_weights else {}
        return pl.pallas_call(
            kernel,
            out_shape=jax.ShapeDtypeStruct((B, d4), out_dtype),
            grid_spec=pltpu.PrefetchScalarGridSpec(
                num_scalar_prefetch=0,
                grid=grid,
                in_specs=[
                    pl.BlockSpec((tile_b, d1), lambda i: (i, 0)),          # x1 tile
                    pl.BlockSpec((tile_b, d2), lambda i: (i, 0)),          # x2 tile
                    pl.BlockSpec((d1, d3p), lambda i: (0, 0), **res_kw),   # W1[:d1]
                    pl.BlockSpec((d2, d3p), lambda i: (0, 0), **res_kw),   # W1[d1:]
                    pl.BlockSpec((1, d3p), lambda i: (0, 0), **res_kw),    # b1 (f32)
                    pl.BlockSpec((d3p, d4), lambda i: (0, 0), **res_kw),   # W2
                    pl.BlockSpec((1, d4), lambda i: (0, 0), **res_kw),     # b2 (f32)
                ],
                out_specs=pl.BlockSpec((tile_b, d4), lambda i: (i, 0)),
            ),
            compiler_params=pltpu.CompilerParams(
                dimension_semantics=("parallel",),   # shards across TCs on v7x
                vmem_limit_bytes=vmem_limit,
            ),
        )(x1, x2, w1a, w1b, b1p, w2p, b2p)

    try:
        return _run(True)
    except Exception:
        # pl.Buffered(1) / pipeline_mode unsupported on this jax version:
        # fall back to plain (double-buffered) resident weight specs.
        return _run(False)


def xavier_normal(key, fan_in, fan_out):
    # torch.nn.init.xavier_normal_: std = sqrt(2 / (fan_in + fan_out))
    std = (2.0 / (fan_in + fan_out)) ** 0.5
    return std * jax.random.normal(key, (fan_in, fan_out), dtype=jnp.float32)


if __name__ == "__main__":
    # Small shapes consistent with MergeLayer(dim1, dim2, dim3, dim4).
    batch, dim1, dim2, dim3, dim4 = 40, 16, 16, 32, 8

    key = jax.random.PRNGKey(0)
    k_x1, k_x2, k_w1, k_b1, k_w2, k_b2 = jax.random.split(key, 6)

    x1 = jax.random.normal(k_x1, (batch, dim1), dtype=jnp.float32)
    x2 = jax.random.normal(k_x2, (batch, dim2), dtype=jnp.float32)

    # Parameters (weights stored pre-transposed as [in, out]).
    w1 = xavier_normal(k_w1, dim1 + dim2, dim3)
    b1 = jax.random.uniform(k_b1, (dim3,), dtype=jnp.float32, minval=-0.1, maxval=0.1)
    w2 = xavier_normal(k_w2, dim3, dim4)
    b2 = jax.random.uniform(k_b2, (dim4,), dtype=jnp.float32, minval=-0.1, maxval=0.1)

    # Pure-JAX reference (f32).
    x = jnp.concatenate([x1, x2], axis=1)
    ref = jnp.maximum(x @ w1 + b1, 0.0) @ w2 + b2

    # 1) Default bf16 MXU path with an explicit small tile: 3-step "parallel"
    #    grid (40 rows / tile 16) exercising the masked ragged last block.
    out_bf16 = merge_layer_forward(x1, x2, w1, b1, w2, b2, tile_b=16)
    out_bf16 = jax.block_until_ready(out_bf16)
    assert out_bf16.shape == (batch, dim4)
    assert jnp.allclose(out_bf16, ref, atol=1e-1, rtol=1e-1)

    # 2) Auto tile selection (whole small batch in one step).
    out_auto = merge_layer_forward(x1, x2, w1, b1, w2, b2)
    out_auto = jax.block_until_ready(out_auto)
    assert out_auto.shape == (batch, dim4)
    assert jnp.allclose(out_auto, ref, atol=1e-1, rtol=1e-1)

    # 3) f32 compute path, tight-tolerance correctness check.
    out_f32 = merge_layer_forward(x1, x2, w1, b1, w2, b2, tile_b=16,
                                  compute_dtype=jnp.float32)
    out_f32 = jax.block_until_ready(out_f32)
    assert out_f32.shape == (batch, dim4)
    assert jnp.allclose(out_f32, ref, atol=1e-4, rtol=1e-4)

    print("KERNEL_OK")
</pallas_src>

<mosaic_0001>
module attributes {stable_mosaic.version = 11 : i64} {
  func.func @kernel(%arg0: i32, %arg1: memref<16x16xf32, #tpu.memory_space<vmem>>, %arg2: memref<16x16xf32, #tpu.memory_space<vmem>>, %arg3: memref<16x128xbf16, #tpu.memory_space<vmem>>, %arg4: memref<16x128xbf16, #tpu.memory_space<vmem>>, %arg5: memref<1x128xf32, #tpu.memory_space<vmem>>, %arg6: memref<128x8xbf16, #tpu.memory_space<vmem>>, %arg7: memref<1x8xf32, #tpu.memory_space<vmem>>, %arg8: memref<16x8xf32, #tpu.memory_space<vmem>>) attributes {dimension_semantics = [#tpu.dimension_semantics<parallel>], iteration_bounds = array<i64: 3>, scalar_prefetch = 0 : i64, scratch_operands = 0 : i64, tpu.core_type = #tpu.core_type<tc>, window_params = [{transform_indices = @transform_0, window_bounds = array<i64: 16, 16>}, {transform_indices = @transform_1, window_bounds = array<i64: 16, 16>}, {pipeline_mode = #tpu.pipeline_mode<synchronous>, transform_indices = @transform_2, window_bounds = array<i64: 16, 128>}, {pipeline_mode = #tpu.pipeline_mode<synchronous>, transform_indices = @transform_3, window_bounds = array<i64: 16, 128>}, {pipeline_mode = #tpu.pipeline_mode<synchronous>, transform_indices = @transform_4, window_bounds = array<i64: 1, 128>}, {pipeline_mode = #tpu.pipeline_mode<synchronous>, transform_indices = @transform_5, window_bounds = array<i64: 128, 8>}, {pipeline_mode = #tpu.pipeline_mode<synchronous>, transform_indices = @transform_6, window_bounds = array<i64: 1, 8>}, {transform_indices = @transform_7, window_bounds = array<i64: 16, 8>}]} {
    %c0 = arith.constant 0 : index
    %c0_0 = arith.constant 0 : index
    %0 = vector.load %arg1[%c0, %c0_0] : memref<16x16xf32, #tpu.memory_space<vmem>>, vector<16x16xf32>
    %1 = arith.truncf %0 : vector<16x16xf32> to vector<16x16xbf16>
    %c0_1 = arith.constant 0 : index
    %c0_2 = arith.constant 0 : index
    %2 = vector.load %arg3[%c0_1, %c0_2] : memref<16x128xbf16, #tpu.memory_space<vmem>>, vector<16x128xbf16>
    %cst = arith.constant dense<0.000000e+00> : vector<16x128xf32>
    %3 = tpu.matmul %1, %2, %cst {dimension_numbers = #tpu.dot_dimension_numbers<[1], [0], [0], [1], [0, 0, 1, 1], [], []>} : vector<16x16xbf16>, vector<16x128xbf16>, vector<16x128xf32> -> vector<16x128xf32>
    %c0_3 = arith.constant 0 : index
    %c0_4 = arith.constant 0 : index
    %4 = vector.load %arg2[%c0_3, %c0_4] : memref<16x16xf32, #tpu.memory_space<vmem>>, vector<16x16xf32>
    %5 = arith.truncf %4 : vector<16x16xf32> to vector<16x16xbf16>
    %c0_5 = arith.constant 0 : index
    %c0_6 = arith.constant 0 : index
    %6 = vector.load %arg4[%c0_5, %c0_6] : memref<16x128xbf16, #tpu.memory_space<vmem>>, vector<16x128xbf16>
    %cst_7 = arith.constant dense<0.000000e+00> : vector<16x128xf32>
    %7 = tpu.matmul %5, %6, %cst_7 {dimension_numbers = #tpu.dot_dimension_numbers<[1], [0], [0], [1], [0, 0, 1, 1], [], []>} : vector<16x16xbf16>, vector<16x128xbf16>, vector<16x128xf32> -> vector<16x128xf32>
    %8 = arith.addf %3, %7 : vector<16x128xf32>
    %c0_8 = arith.constant 0 : index
    %c0_9 = arith.constant 0 : index
    %9 = vector.load %arg5[%c0_8, %c0_9] : memref<1x128xf32, #tpu.memory_space<vmem>>, vector<1x128xf32>
    %10 = vector.broadcast %9 : vector<1x128xf32> to vector<16x128xf32>
    %11 = arith.addf %8, %10 : vector<16x128xf32>
    %cst_10 = arith.constant 0.000000e+00 : f32
    %12 = vector.broadcast %cst_10 : f32 to vector<16x128xf32>
    %13 = arith.maximumf %11, %12 : vector<16x128xf32>
    %14 = arith.truncf %13 : vector<16x128xf32> to vector<16x128xbf16>
    %c0_11 = arith.constant 0 : index
    %c0_12 = arith.constant 0 : index
    %15 = vector.load %arg6[%c0_11, %c0_12] : memref<128x8xbf16, #tpu.memory_space<vmem>>, vector<128x8xbf16>
    %cst_13 = arith.constant dense<0.000000e+00> : vector<16x8xf32>
    %16 = tpu.matmul %14, %15, %cst_13 {dimension_numbers = #tpu.dot_dimension_numbers<[1], [0], [0], [1], [0, 0, 1, 1], [], []>} : vector<16x128xbf16>, vector<128x8xbf16>, vector<16x8xf32> -> vector<16x8xf32>
    %c0_14 = arith.constant 0 : index
    %c0_15 = arith.constant 0 : index
    %17 = vector.load %arg7[%c0_14, %c0_15] : memref<1x8xf32, #tpu.memory_space<vmem>>, vector<1x8xf32>
    %18 = vector.broadcast %17 : vector<1x8xf32> to vector<16x8xf32>
    %19 = arith.addf %16, %18 : vector<16x8xf32>
    %c0_16 = arith.constant 0 : index
    %c0_17 = arith.constant 0 : index
    %20 = vector.load %arg8[%c0_16, %c0_17] : memref<16x8xf32, #tpu.memory_space<vmem>>, vector<16x8xf32>
    tpu.vector_store %arg8[%c0_16, %c0_17], %19 {strides = array<i32>} : memref<16x8xf32, #tpu.memory_space<vmem>>, vector<16x8xf32>,
    return
  }
  func.func @transform_0(%arg0: i32) -> (i32, i32) {
    %c0_i32 = arith.constant 0 : i32
    %c0_i32_0 = arith.constant 0 : i32
    return %arg0, %c0_i32 : i32, i32
  }
  func.func @transform_1(%arg0: i32) -> (i32, i32) {
    %c0_i32 = arith.constant 0 : i32
    %c0_i32_0 = arith.constant 0 : i32
    return %arg0, %c0_i32 : i32, i32
  }
  func.func @transform_2(%arg0: i32) -> (i32, i32) {
    %c0_i32 = arith.constant 0 : i32
    %c0_i32_0 = arith.constant 0 : i32
    %c0_i32_1 = arith.constant 0 : i32
    return %c0_i32, %c0_i32_0 : i32, i32
  }
  func.func @transform_3(%arg0: i32) -> (i32, i32) {
    %c0_i32 = arith.constant 0 : i32
    %c0_i32_0 = arith.constant 0 : i32
    %c0_i32_1 = arith.constant 0 : i32
    return %c0_i32, %c0_i32_0 : i32, i32
  }
  func.func @transform_4(%arg0: i32) -> (i32, i32) {
    %c0_i32 = arith.constant 0 : i32
    %c0_i32_0 = arith.constant 0 : i32
    %c0_i32_1 = arith.constant 0 : i32
    return %c0_i32, %c0_i32_0 : i32, i32
  }
  func.func @transform_5(%arg0: i32) -> (i32, i32) {
    %c0_i32 = arith.constant 0 : i32
    %c0_i32_0 = arith.constant 0 : i32
    %c0_i32_1 = arith.constant 0 : i32
    return %c0_i32, %c0_i32_0 : i32, i32
  }
  func.func @transform_6(%arg0: i32) -> (i32, i32) {
    %c0_i32 = arith.constant 0 : i32
    %c0_i32_0 = arith.constant 0 : i32
    %c0_i32_1 = arith.constant 0 : i32
    return %c0_i32, %c0_i32_0 : i32, i32
  }
  func.func @transform_7(%arg0: i32) -> (i32, i32) {
    %c0_i32 = arith.constant 0 : i32
    %c0_i32_0 = arith.constant 0 : i32
    return %arg0, %c0_i32 : i32, i32
  }
}

module attributes {stable_mosaic.version = 11 : i64} {
  func.func @kernel(%arg0: i32, %arg1: memref<16x16xf32, #tpu.memory_space<vmem>>, %arg2: memref<16x16xf32, #tpu.memory_space<vmem>>, %arg3: memref<16x128xbf16, #tpu.memory_space<vmem>>, %arg4: memref<16x128xbf16, #tpu.memory_space<vmem>>, %arg5: memref<1x128xf32, #tpu.memory_space<vmem>>, %arg6: memref<128x8xbf16, #tpu.memory_space<vmem>>, %arg7: memref<1x8xf32, #tpu.memory_space<vmem>>, %arg8: memref<16x8xf32, #tpu.memory_space<vmem>>) attributes {dimension_semantics = [#tpu.dimension_semantics<parallel>], iteration_bounds = array<i64: 3>, scalar_prefetch = 0 : i64, scratch_operands = 0 : i64, tpu.core_type = #tpu.core_type<tc>, window_params = [{transform_indices = @transform_0, window_bounds = array<i64: 16, 16>}, {transform_indices = @transform_1, window_bounds = array<i64: 16, 16>}, {pipeline_mode = #tpu.pipeline_mode<synchronous>, transform_indices = @transform_2, window_bounds = array<i64: 16, 128>}, {pipeline_mode = #tpu.pipeline_mode<synchronous>, transform_indices = @transform_3, window_bounds = array<i64: 16, 128>}, {pipeline_mode = #tpu.pipeline_mode<synchronous>, transform_indices = @transform_4, window_bounds = array<i64: 1, 128>}, {pipeline_mode = #tpu.pipeline_mode<synchronous>, transform_indices = @transform_5, window_bounds = array<i64: 128, 8>}, {pipeline_mode = #tpu.pipeline_mode<synchronous>, transform_indices = @transform_6, window_bounds = array<i64: 1, 8>}, {transform_indices = @transform_7, window_bounds = array<i64: 16, 8>}]} {
    %c0 = arith.constant 0 : index
    %c0_0 = arith.constant 0 : index
    %0 = vector.load %arg1[%c0, %c0_0] : memref<16x16xf32, #tpu.memory_space<vmem>>, vector<16x16xf32>
    %1 = arith.truncf %0 : vector<16x16xf32> to vector<16x16xbf16>
    %c0_1 = arith.constant 0 : index
    %c0_2 = arith.constant 0 : index
    %2 = vector.load %arg3[%c0_1, %c0_2] : memref<16x128xbf16, #tpu.memory_space<vmem>>, vector<16x128xbf16>
    %cst = arith.constant dense<0.000000e+00> : vector<16x128xf32>
    %3 = tpu.matmul %1, %2, %cst {dimension_numbers = #tpu.dot_dimension_numbers<[1], [0], [0], [1], [0, 0, 1, 1], [], []>} : vector<16x16xbf16>, vector<16x128xbf16>, vector<16x128xf32> -> vector<16x128xf32>
    %c0_3 = arith.constant 0 : index
    %c0_4 = arith.constant 0 : index
    %4 = vector.load %arg2[%c0_3, %c0_4] : memref<16x16xf32, #tpu.memory_space<vmem>>, vector<16x16xf32>
    %5 = arith.truncf %4 : vector<16x16xf32> to vector<16x16xbf16>
    %c0_5 = arith.constant 0 : index
    %c0_6 = arith.constant 0 : index
    %6 = vector.load %arg4[%c0_5, %c0_6] : memref<16x128xbf16, #tpu.memory_space<vmem>>, vector<16x128xbf16>
    %cst_7 = arith.constant dense<0.000000e+00> : vector<16x128xf32>
    %7 = tpu.matmul %5, %6, %cst_7 {dimension_numbers = #tpu.dot_dimension_numbers<[1], [0], [0], [1], [0, 0, 1, 1], [], []>} : vector<16x16xbf16>, vector<16x128xbf16>, vector<16x128xf32> -> vector<16x128xf32>
    %8 = arith.addf %3, %7 : vector<16x128xf32>
    %c0_8 = arith.constant 0 : index
    %c0_9 = arith.constant 0 : index
    %9 = vector.load %arg5[%c0_8, %c0_9] : memref<1x128xf32, #tpu.memory_space<vmem>>, vector<1x128xf32>
    %10 = vector.broadcast %9 : vector<1x128xf32> to vector<16x128xf32>
    %11 = arith.addf %8, %10 : vector<16x128xf32>
    %cst_10 = arith.constant 0.000000e+00 : f32
    %12 = vector.broadcast %cst_10 : f32 to vector<16x128xf32>
    %13 = arith.maximumf %11, %12 : vector<16x128xf32>
    %14 = arith.truncf %13 : vector<16x128xf32> to vector<16x128xbf16>
    %c0_11 = arith.constant 0 : index
    %c0_12 = arith.constant 0 : index
    %15 = vector.load %arg6[%c0_11, %c0_12] : memref<128x8xbf16, #tpu.memory_space<vmem>>, vector<128x8xbf16>
    %cst_13 = arith.constant dense<0.000000e+00> : vector<16x8xf32>
    %16 = tpu.matmul %14, %15, %cst_13 {dimension_numbers = #tpu.dot_dimension_numbers<[1], [0], [0], [1], [0, 0, 1, 1], [], []>} : vector<16x128xbf16>, vector<128x8xbf16>, vector<16x8xf32> -> vector<16x8xf32>
    %c0_14 = arith.constant 0 : index
    %c0_15 = arith.constant 0 : index
    %17 = vector.load %arg7[%c0_14, %c0_15] : memref<1x8xf32, #tpu.memory_space<vmem>>, vector<1x8xf32>
    %18 = vector.broadcast %17 : vector<1x8xf32> to vector<16x8xf32>
    %19 = arith.addf %16, %18 : vector<16x8xf32>
    %c0_16 = arith.constant 0 : index
    %c0_17 = arith.constant 0 : index
    %20 = vector.load %arg8[%c0_16, %c0_17] : memref<16x8xf32, #tpu.memory_space<vmem>>, vector<16x8xf32>
    tpu.vector_store %arg8[%c0_16, %c0_17], %19 {strides = array<i32>} : memref<16x8xf32, #tpu.memory_space<vmem>>, vector<16x8xf32>,
    return
  }
  func.func @transform_0(%arg0: i32) -> (i32, i32) {
    %c0_i32 = arith.constant 0 : i32
    %c0_i32_0 = arith.constant 0 : i32
    return %arg0, %c0_i32 : i32, i32
  }
  func.func @transform_1(%arg0: i32) -> (i32, i32) {
    %c0_i32 = arith.constant 0 : i32
    %c0_i32_0 = arith.constant 0 : i32
    return %arg0, %c0_i32 : i32, i32
  }
  func.func @transform_2(%arg0: i32) -> (i32, i32) {
    %c0_i32 = arith.constant 0 : i32
    %c0_i32_0 = arith.constant 0 : i32
    %c0_i32_1 = arith.constant 0 : i32
    return %c0_i32, %c0_i32_0 : i32, i32
  }
  func.func @transform_3(%arg0: i32) -> (i32, i32) {
    %c0_i32 = arith.constant 0 : i32
    %c0_i32_0 = arith.constant 0 : i32
    %c0_i32_1 = arith.constant 0 : i32
    return %c0_i32, %c0_i32_0 : i32, i32
  }
  func.func @transform_4(%arg0: i32) -> (i32, i32) {
    %c0_i32 = arith.constant 0 : i32
    %c0_i32_0 = arith.constant 0 : i32
    %c0_i32_1 = arith.constant 0 : i32
    return %c0_i32, %c0_i32_0 : i32, i32
  }
  func.func @transform_5(%arg0: i32) -> (i32, i32) {
    %c0_i32 = arith.constant 0 : i32
    %c0_i32_0 = arith.constant 0 : i32
    %c0_i32_1 = arith.constant 0 : i32
    return %c0_i32, %c0_i32_0 : i32, i32
  }
  func.func @transform_6(%arg0: i32) -> (i32, i32) {
    %c0_i32 = arith.constant 0 : i32
    %c0_i32_0 = arith.constant 0 : i32
    %c0_i32_1 = arith.constant 0 : i32
    return %c0_i32, %c0_i32_0 : i32, i32
  }
  func.func @transform_7(%arg0: i32) -> (i32, i32) {
    %c0_i32 = arith.constant 0 : i32
    %c0_i32_0 = arith.constant 0 : i32
    return %arg0, %c0_i32 : i32, i32
  }
}

</mosaic_0001>

<bundles_post_ra>
// kernel: tpu_custom_call.1
= control target key start
LH: loop header
LB: loop body
LE: loop exit
PB: predicated region body
PF: predicated region fallthrough
CT: control target
= control target key end

     0   :  { %s1131_s24 = smov 0   ;;  %s1133_s25 = smov 0   ;;  %s1256_s0 = inlined_call_operand.vmem [shape: f32[40,16], index: 0, kind: input, shape index: {}]   ;;  %s1257_s1 = inlined_call_operand.vmem [shape: f32[40,16], index: 1, kind: input, shape index: {}]   ;;  %s1258_s2 = inlined_call_operand.vmem [shape: bf16[16,128], index: 2, kind: input, shape index: {}]   ;;  %s1259_s3 = inlined_call_operand.vmem [shape: bf16[16,128], index: 3, kind: input, shape index: {}]   ;;  %s1260_s4 = inlined_call_operand.vmem [shape: f32[1,128], index: 4, kind: input, shape index: {}]   ;;  %s1261_s5 = inlined_call_operand.vmem [shape: bf16[128,8], index: 5, kind: input, shape index: {}]   ;;  %s1262_s6 = inlined_call_operand.vmem [shape: f32[1,8], index: 6, kind: input, shape index: {}]   ;;  %s1263_s7 = inlined_call_operand.vmem [shape: f32[40,8], index: 7, kind: output, shape index: {}]  }
   0x1   :  { %s1135_s26 = smov 0  }
   0x2 LB: > { %s1144_s27 = sadd.s32 4294967295, %s1055_s26   ;;  %s1146_s28 = sadd.s32 1, %s1055_s26   ;;  %s1055_s26 = sphi %s1135_s26, %s1267_s26   ;;  %s1051_s25 = sphi %s1133_s25, %s1266_s25   ;;  %s1047_s24 = sphi %s1131_s24, %s1265_s24  }
   0x3   : > { %s178_s29 = ssub.s32 %s1055_s26, %s1146_s28  ;;  %s181_s30 = sadd.s32 1, %s1051_s25 }
   0x4   : > { %p179_p0 = scmp.eq.s32.totalorder %s178_s29, 0  ;;  %p191_p1 = scmp.ne.s32.totalorder %s1051_s25, %s1047_s24 }
   0x5   : > { %p192_p2 = scmp.eq.s32.totalorder %s1144_s27, 2  ;;  %p816_p3 = scmp.ge.s32.totalorder %s1055_s26, 1 }
   0x6   : > { %s1154_s8 = scalar_select %p179_p0, %s1051_s25, %s181_s30  }
   0x7   : > { %p1156_p4 = por %p192_p2, %p191_p1  ;;  %p265_p5 = scmp.lt.s32.totalorder %s1055_s26, 4 }
   0x9   : > { %p266_p6 = pnand %p816_p3, %p265_p5 }
   0xa   : > { %s1164_s12 = sshll.u32 (!%p266_p6), %s1144_s27, 1  ;;  %s306_s29 = sand.u32 (!%p266_p6), 1, %s1047_s24  }
   0xb   : > { %269 = sbr.rel (%p266_p6) target bundleno = 475 (0x1db), region = 48  ;;  %p314_p7 = scmp.lt.s32.totalorder (!%p266_p6), %s1164_s12, 4 }
   0xc   : > { %s817_s30 = sshll.u32 (!%p266_p6), %s306_s29, 4 }
   0xd   : > { %s1211_s13 = scalar_lea.vmem (!%p266_p6), [#allocation2], %s817_s30  }
  0x10   : > { %v991_v0 = vld [vmem:[%s1259_s3] sm:$0xff]   ;;  %v1089_v1 = vmov 0.0   ;;  %vm1090_vm0 = vmmov 0   ;;  %v993_v2 = vld [vmem:[%s1261_s5 + $0x38] sm:$0xff]   ;;  %s315_s15 = scalar_select %p314_p7, %s1164_s12, 4  ;;  %v994_v3 = vld [vmem:[%s1261_s5 + $0x30] sm:$0xff]  }
  0x11   : > { %869 = vmatprep.subr.bf16.mxu1 %v1089_v1  ;;  %881 = vmatprep.subr.bf16.mxu0 %v1089_v1  ;;  %v992_v5 = vld [vmem:[%s1258_s2] sm:$0xff]   ;;  %v995_v6 = vld [vmem:[%s1261_s5 + $0x28] sm:$0xff]   ;;  %vm359_vm1 = vcmask 130048   ;;  %v997_v13 = vld [vmem:[%s1261_s5 + $0x18] sm:$0xff]   ;;  %vm578_vm2 = vcmask 64512   ;;  %s589_s24 = ssub.s32 (%p1156_p4), 5, %s1164_s12 }
  0x12   : > { %870 = vmatpush3.bf16.msra.mxu1 %v991_v0  ;;  %871 = vmatprep.mubr.msk.bf16.mxu1 %vm1090_vm0, %v1089_v1  ;;  %s819_s18 = sshll.u32 %s315_s15, 3  ;;  %v996_v12 = vld [vmem:[%s1261_s5 + $0x20] sm:$0xff]   ;;  %v998_v14 = vld [vmem:[%s1261_s5 + $0x10] sm:$0xff]   ;;  %v999_v15 = vld [vmem:[%s1261_s5 + $0x8] sm:$0xff]   ;;  %s853_s14 = sshll.u32 (%p1156_p4), %s1144_s27, 4 }
  0x13   : > { %875 = vmatprep.subr.bf16.mxu1 %v1089_v1  ;;  %897 = vmatprep.mubr.msk.bf16.mxu0 %vm1090_vm0, %v1089_v1  ;;  %s331_s21 = scalar_lea.vmem %s1257_s1, %s819_s18  ;;  %s317_s11 = scalar_lea.vmem %s1256_s0, %s819_s18  ;;  %v1000_v16 = vld [vmem:[%s1261_s5] sm:$0xff]  }
  0x14   : > { %882 = vmatpush3.bf16.msra.mxu0 %v993_v2  ;;  %v348_v4 = vld [vmem:[%s331_s21] sm:$0xff]  ;;  %v349_v7 = vld [vmem:[%s331_s21 + $0x8] sm:$0xff]  ;;  %p590_p8 = scmp.lt.s32.totalorder (%p1156_p4), %s589_s24, 2  ;;  %s1222_s17 = scalar_lea.vmem (%p1156_p4), %s1263_s7, %s853_s14  }
  0x15   : > { %883 = vmatprep.subr.bf16.mxu0 %v1089_v1  ;;  %v350_v8 = vpack.c.bf16 %v349_v7, %v348_v4  ;;  %v343_v9 = vld [vmem:[%s317_s11] sm:$0xff]  ;;  %v344_v10 = vld [vmem:[%s317_s11 + $0x8] sm:$0xff] }
  0x16   : > { %v345_v11 = vpack.c.bf16 %v344_v10, %v343_v9  ;;  %v826_v23 = vld [vmem:[%s1260_s4] ss:$0 sm:$0xff] }
  0x17   : > { %872 = vmatmul.mubr.msk.bf16.vlgmr.msra.gmra.mxu1 %vm359_vm1, %v350_v8  ;;  %v827_v33 = vld [vmem:[%s1262_s6] ss:$0 sm:$0xff] }
  0x18   : > { %884 = vmatpush3.bf16.msra.mxu0 %v994_v3  ;;  %876 = vmatpush3.bf16.msra.mxu1 %v992_v5 }
  0x19   : > { %885 = vmatprep.subr.bf16.mxu0 %v1089_v1  ;;  %877 = vmatprep.mubr.msk.bf16.mxu1 %vm1090_vm0, %v1089_v1 }
  0x1c   : > { %886 = vmatpush3.bf16.msra.mxu0 %v995_v6 }
  0x1d   : > { %887 = vmatprep.subr.bf16.mxu0 %v1089_v1 }
  0x1f   : > { %878 = vmatmul.mubr.msk.bf16.vlgmr.msra.gmra.mxu1 %vm359_vm1, %v345_v11 }
  0x20   : > { %888 = vmatpush3.bf16.msra.mxu0 %v996_v12 }
  0x21   : > { %889 = vmatprep.subr.bf16.mxu0 %v1089_v1 }
  0x24   : > { %890 = vmatpush3.bf16.msra.mxu0 %v997_v13 }
  0x25   : > { %891 = vmatprep.subr.bf16.mxu0 %v1089_v1 }
  0x28   : > { %892 = vmatpush3.bf16.msra.mxu0 %v998_v14 }
  0x29   : > { %893 = vmatprep.subr.bf16.mxu0 %v1089_v1 }
  0x2c   : > { %894 = vmatpush3.bf16.msra.mxu0 %v999_v15 }
  0x2d   : > { %895 = vmatprep.subr.bf16.mxu0 %v1089_v1 }
  0x30   : > { %896 = vmatpush3.bf16.msra.mxu0 %v1000_v16 }
  0xd7   : > { %v397_v17 = vpop.f32.mrf.mxu1 }
  0xd9   : > { %v873_v18 = vpop.f32.mrf.mxu1 }
  0xdb   : > { %v400_v19 = vpop.f32.mrf.mxu1 }
  0xdd   : > { %v874_v20 = vpop.f32.mrf.mxu1 }
  0xdf   : > { %v447_v21 = vpop.f32.mrf.mxu1 }
  0xe0   : > { %v448_v22 = vadd.f32 %v447_v21, %v397_v17 }
  0xe1   : > { %v879_v24 = vpop.f32.mrf.mxu1 }
  0xe2   : > { %v461_v26 = vadd.f32 %v826_v23, %v448_v22 }
  0xe3   : > { %v450_v25 = vpop.f32.mrf.mxu1 }
  0xe4   : > { %v451_v27 = vadd.f32 %v450_v25, %v400_v19  ;;  %v463_v30 = vmax.f32 %v461_v26, 0.0 }
  0xe5   : > { %v880_v28 = vpop.f32.mrf.mxu1 }
  0xe6   : > { %v462_v29 = vadd.f32 %v826_v23, %v451_v27 }
  0xe8   : > { %v464_v31 = vmax.f32 %v462_v29, 0.0 }
  0xea   : > { %v465_v32 = vpack.c.bf16 %v464_v31, %v463_v30 }
  0xec   : > { %898 = vmatmul.mubr.bf16.vlgmr.msra.gmra.mxu0 %v465_v32 }
 0x1ac   : > { %v571_v34 = vpop.f32.mrf.mxu0 }
 0x1ad   : > { %v572_v35 = vadd.f32 %v827_v33, %v571_v34 }
 0x1ae   : > { %v899_v36 = vpop.f32.mrf.mxu0 }
 0x1af   : > { %579 = vst.msk [vmem:[%s1211_s13] sm:$0xff] %vm578_vm2, %v572_v35  ;;  %587 = sbr.rel (!%p1156_p4) target bundleno = 475 (0x1db), region = 52 }
 0x1b0   : > { %v574_v37 = vpop.f32.mrf.mxu0 }
 0x1b1   : > { %v575_v38 = vadd.f32 %v827_v33, %v574_v37 }
 0x1b2   : > { %v900_v39 = vpop.f32.mrf.mxu0 }
 0x1b3   : > { %580 = vst.msk [vmem:[%s1211_s13 + $0x8] sm:$0xff] %vm578_vm2, %v575_v38 }
 0x1b4   : > { %s1269_s24 = smov (!%p590_p8, %s589_s24), 2 }
 0x1b5   : > { %s838_s18 = sshll.u32 %s1269_s24, 7 }
 0x1b6   : > { %p841_p9 = scmp.eq.s32.totalorder %s838_s18, 0 }
 0x1b7   : > { %s1228_s19 = sshrl.u32 (!%p841_p9), %s1269_s24, 1 }
 0x1b8   : > { %598 = sbr.rel (%p841_p9) target bundleno = 475 (0x1db), region = 56  ;;  %p842_p10 = scmp.le.s32.totalorder (!%p841_p9), %s1228_s19, 0 }
 0x1bd   : > { %763 = sbr.rel (%p842_p10) target bundleno = 458 (0x1ca), region = 135  ;;  %s1057_s27 = smov (!%p842_p10), %s1222_s17  }
 0x1be   : > { %s1061_s9 = smov (!%p842_p10), %s1211_s13   ;;  %s1065_s12 = smov (!%p842_p10), 0  }
 0x1bf   : > { %s1069_s20 = smov (!%p842_p10), 0  }
 0x1c2 LB: >> { %v663_v40 = vld [vmem:[%s1063_s9] sm:$0xff]  ;;  %v665_v41 = vld [vmem:[%s1063_s9 + $0x8] sm:$0xff]  ;;  %s667_s21 = sadd.s32 1, %s1067_s12  ;;  %s657_s20 = sadd.s32 1, %s1071_s20   ;;  %s1071_s20 = sphi %s1069_s20, %s657_s20   ;;  %s1067_s12 = sphi %s1065_s12, %s1066_s12   ;;  %s1063_s9 = sphi %s1061_s9, %s672_s9   ;;  %s1059_s27 = sphi %s1057_s27, %s673_s27  }
 0x1c3   : >> { %664 = vst [vmem:[%s1059_s27] sm:$0xff] %v663_v40  ;;  %666 = vst [vmem:[%s1059_s27 + $0x8] sm:$0xff] %v665_v41  ;;  %p668_p11 = scmp.ge.s32.totalorder %s667_s21, %s1228_s19  ;;  %p656_p12 = scmp.ge.s32.totalorder %s657_s20, %s1228_s19 }
 0x1c5   : >> { %s1271_s21 = smov (%p668_p11, %s667_s21), 0  ;;  %659 = sbr.rel (!%p656_p12) target bundleno = 450 (0x1c2), region = 141 }
 0x1c6   : >> { %s843_s22 = sshll.u32 %s1271_s21, 4  ;;  %s1066_s12 = smov %s1271_s21  }
 0x1c7   : >> { %s672_s9 = scalar_lea.vmem %s1211_s13, %s843_s22 [#allocation2]   ;;  %s673_s27 = scalar_lea.vmem %s1222_s17, %s843_s22  }
 0x1ca PF: > { %s1238_s23 = sand.u32 1, %s1269_s24   ;;  %s854_s26 = sshll.u32 %s1228_s19, 4 }
 0x1cb   : > { %s678_s29 = scalar_lea.vmem %s1211_s13, %s854_s26 [#allocation2]   ;;  %s680_s30 = scalar_lea.vmem %s1222_s17, %s854_s26  }
 0x1cc   : > { %p848_p13 = scmp.le.s32.totalorder %s1238_s23, 0 }
 0x1cd   : > { %s1073_s10 = smov (!%p848_p13), %s680_s30   ;;  %s1077_s11 = smov (!%p848_p13), %s678_s29  }
 0x1ce   : > { %777 = sbr.rel (%p848_p13) target bundleno = 475 (0x1db), region = 146  ;;  %s1081_s14 = smov (!%p848_p13), 0  }
 0x1cf   : > { %s1085_s15 = smov (!%p848_p13), 0  }
 0x1d3 LB: >> { %v690_v42 = vld [vmem:[%s1079_s11] sm:$0xff]  ;;  %s692_s24 = sadd.s32 1, %s1083_s14  ;;  %s684_s15 = sadd.s32 1, %s1087_s15   ;;  %s1087_s15 = sphi %s1085_s15, %s684_s15   ;;  %s1083_s14 = sphi %s1081_s14, %s1082_s14   ;;  %s1079_s11 = sphi %s1077_s11, %s697_s11   ;;  %s1075_s10 = sphi %s1073_s10, %s698_s10  }
 0x1d4   : >> { %691 = vst [vmem:[%s1075_s10] sm:$0xff] %v690_v42  ;;  %p693_p0 = scmp.ge.s32.totalorder %s692_s24, %s1238_s23  ;;  %p683_p1 = scmp.ge.s32.totalorder %s684_s15, %s1238_s23 }
 0x1d6   : >> { %s1273_s24 = smov (%p693_p0, %s692_s24), 0  ;;  %686 = sbr.rel (!%p683_p1) target bundleno = 467 (0x1d3), region = 152 }
 0x1d7   : >> { %s849_s13 = sshll.u32 %s1273_s24, 3  ;;  %s1082_s14 = smov %s1273_s24  }
 0x1d8   : >> { %s697_s11 = scalar_lea.vmem %s678_s29, %s849_s13 [#allocation2]   ;;  %s698_s10 = scalar_lea.vmem %s680_s30, %s849_s13  }
 0x1db PF: > { %p14_p2 = scmp.ge.s32.totalorder %s1146_s28, 5   ;;  %s1265_s24 = smov %s1051_s25 }
 0x1dc   : > { %s1266_s25 = smov %s1154_s8  ;;  %s1267_s26 = smov %s1146_s28 }
 0x1dd   :  { %16 = sbr.rel (!%p14_p2) target bundleno = 2 (0x2), region = 163 }

// kernel: tpu_custom_call.1
= control target key start
LH: loop header
LB: loop body
LE: loop exit
PB: predicated region body
PF: predicated region fallthrough
CT: control target
= control target key end

     0   :  { %s1131_s24 = smov 0   ;;  %s1133_s25 = smov 0   ;;  %s1256_s0 = inlined_call_operand.vmem [shape: f32[40,16], index: 0, kind: input, shape index: {}]   ;;  %s1257_s1 = inlined_call_operand.vmem [shape: f32[40,16], index: 1, kind: input, shape index: {}]   ;;  %s1258_s2 = inlined_call_operand.vmem [shape: bf16[16,128], index: 2, kind: input, shape index: {}]   ;;  %s1259_s3 = inlined_call_operand.vmem [shape: bf16[16,128], index: 3, kind: input, shape index: {}]   ;;  %s1260_s4 = inlined_call_operand.vmem [shape: f32[1,128], index: 4, kind: input, shape index: {}]   ;;  %s1261_s5 = inlined_call_operand.vmem [shape: bf16[128,8], index: 5, kind: input, shape index: {}]   ;;  %s1262_s6 = inlined_call_operand.vmem [shape: f32[1,8], index: 6, kind: input, shape index: {}]   ;;  %s1263_s7 = inlined_call_operand.vmem [shape: f32[40,8], index: 7, kind: output, shape index: {}]  }
   0x1   :  { %s1135_s26 = smov 0  }
   0x2 LB: > { %s1144_s27 = sadd.s32 4294967295, %s1055_s26   ;;  %s1146_s28 = sadd.s32 1, %s1055_s26   ;;  %s1055_s26 = sphi %s1135_s26, %s1267_s26   ;;  %s1051_s25 = sphi %s1133_s25, %s1266_s25   ;;  %s1047_s24 = sphi %s1131_s24, %s1265_s24  }
   0x3   : > { %s178_s29 = ssub.s32 %s1055_s26, %s1146_s28  ;;  %s181_s30 = sadd.s32 1, %s1051_s25 }
   0x4   : > { %p179_p0 = scmp.eq.s32.totalorder %s178_s29, 0  ;;  %p191_p1 = scmp.ne.s32.totalorder %s1051_s25, %s1047_s24 }
   0x5   : > { %p192_p2 = scmp.eq.s32.totalorder %s1144_s27, 2  ;;  %p816_p3 = scmp.ge.s32.totalorder %s1055_s26, 1 }
   0x6   : > { %s1154_s8 = scalar_select %p179_p0, %s1051_s25, %s181_s30  }
   0x7   : > { %p1156_p4 = por %p192_p2, %p191_p1  ;;  %p265_p5 = scmp.lt.s32.totalorder %s1055_s26, 4 }
   0x9   : > { %p266_p6 = pnand %p816_p3, %p265_p5 }
   0xa   : > { %s1164_s12 = sshll.u32 (!%p266_p6), %s1144_s27, 1  ;;  %s306_s29 = sand.u32 (!%p266_p6), 1, %s1047_s24  }
   0xb   : > { %269 = sbr.rel (%p266_p6) target bundleno = 475 (0x1db), region = 48  ;;  %p314_p7 = scmp.lt.s32.totalorder (!%p266_p6), %s1164_s12, 4 }
   0xc   : > { %s817_s30 = sshll.u32 (!%p266_p6), %s306_s29, 4 }
   0xd   : > { %s1211_s13 = scalar_lea.vmem (!%p266_p6), [#allocation2], %s817_s30  }
  0x10   : > { %v991_v0 = vld [vmem:[%s1259_s3] sm:$0xff]   ;;  %v1089_v1 = vmov 0.0   ;;  %vm1090_vm0 = vmmov 0   ;;  %v993_v2 = vld [vmem:[%s1261_s5 + $0x38] sm:$0xff]   ;;  %s315_s15 = scalar_select %p314_p7, %s1164_s12, 4  ;;  %v994_v3 = vld [vmem:[%s1261_s5 + $0x30] sm:$0xff]  }
  0x11   : > { %869 = vmatprep.subr.bf16.mxu1 %v1089_v1  ;;  %881 = vmatprep.subr.bf16.mxu0 %v1089_v1  ;;  %v992_v5 = vld [vmem:[%s1258_s2] sm:$0xff]   ;;  %v995_v6 = vld [vmem:[%s1261_s5 + $0x28] sm:$0xff]   ;;  %vm359_vm1 = vcmask 130048   ;;  %v997_v13 = vld [vmem:[%s1261_s5 + $0x18] sm:$0xff]   ;;  %vm578_vm2 = vcmask 64512   ;;  %s589_s24 = ssub.s32 (%p1156_p4), 5, %s1164_s12 }
  0x12   : > { %870 = vmatpush3.bf16.msra.mxu1 %v991_v0  ;;  %871 = vmatprep.mubr.msk.bf16.mxu1 %vm1090_vm0, %v1089_v1  ;;  %s819_s18 = sshll.u32 %s315_s15, 3  ;;  %v996_v12 = vld [vmem:[%s1261_s5 + $0x20] sm:$0xff]   ;;  %v998_v14 = vld [vmem:[%s1261_s5 + $0x10] sm:$0xff]   ;;  %v999_v15 = vld [vmem:[%s1261_s5 + $0x8] sm:$0xff]   ;;  %s853_s14 = sshll.u32 (%p1156_p4), %s1144_s27, 4 }
  0x13   : > { %875 = vmatprep.subr.bf16.mxu1 %v1089_v1  ;;  %897 = vmatprep.mubr.msk.bf16.mxu0 %vm1090_vm0, %v1089_v1  ;;  %s331_s21 = scalar_lea.vmem %s1257_s1, %s819_s18  ;;  %s317_s11 = scalar_lea.vmem %s1256_s0, %s819_s18  ;;  %v1000_v16 = vld [vmem:[%s1261_s5] sm:$0xff]  }
  0x14   : > { %882 = vmatpush3.bf16.msra.mxu0 %v993_v2  ;;  %v348_v4 = vld [vmem:[%s331_s21] sm:$0xff]  ;;  %v349_v7 = vld [vmem:[%s331_s21 + $0x8] sm:$0xff]  ;;  %p590_p8 = scmp.lt.s32.totalorder (%p1156_p4), %s589_s24, 2  ;;  %s1222_s17 = scalar_lea.vmem (%p1156_p4), %s1263_s7, %s853_s14  }
  0x15   : > { %883 = vmatprep.subr.bf16.mxu0 %v1089_v1  ;;  %v350_v8 = vpack.c.bf16 %v349_v7, %v348_v4  ;;  %v343_v9 = vld [vmem:[%s317_s11] sm:$0xff]  ;;  %v344_v10 = vld [vmem:[%s317_s11 + $0x8] sm:$0xff] }
  0x16   : > { %v345_v11 = vpack.c.bf16 %v344_v10, %v343_v9  ;;  %v826_v23 = vld [vmem:[%s1260_s4] ss:$0 sm:$0xff] }
  0x17   : > { %872 = vmatmul.mubr.msk.bf16.vlgmr.msra.gmra.mxu1 %vm359_vm1, %v350_v8  ;;  %v827_v33 = vld [vmem:[%s1262_s6] ss:$0 sm:$0xff] }
  0x18   : > { %884 = vmatpush3.bf16.msra.mxu0 %v994_v3  ;;  %876 = vmatpush3.bf16.msra.mxu1 %v992_v5 }
  0x19   : > { %885 = vmatprep.subr.bf16.mxu0 %v1089_v1  ;;  %877 = vmatprep.mubr.msk.bf16.mxu1 %vm1090_vm0, %v1089_v1 }
  0x1c   : > { %886 = vmatpush3.bf16.msra.mxu0 %v995_v6 }
  0x1d   : > { %887 = vmatprep.subr.bf16.mxu0 %v1089_v1 }
  0x1f   : > { %878 = vmatmul.mubr.msk.bf16.vlgmr.msra.gmra.mxu1 %vm359_vm1, %v345_v11 }
  0x20   : > { %888 = vmatpush3.bf16.msra.mxu0 %v996_v12 }
  0x21   : > { %889 = vmatprep.subr.bf16.mxu0 %v1089_v1 }
  0x24   : > { %890 = vmatpush3.bf16.msra.mxu0 %v997_v13 }
  0x25   : > { %891 = vmatprep.subr.bf16.mxu0 %v1089_v1 }
  0x28   : > { %892 = vmatpush3.bf16.msra.mxu0 %v998_v14 }
  0x29   : > { %893 = vmatprep.subr.bf16.mxu0 %v1089_v1 }
  0x2c   : > { %894 = vmatpush3.bf16.msra.mxu0 %v999_v15 }
  0x2d   : > { %895 = vmatprep.subr.bf16.mxu0 %v1089_v1 }
  0x30   : > { %896 = vmatpush3.bf16.msra.mxu0 %v1000_v16 }
  0xd7   : > { %v397_v17 = vpop.f32.mrf.mxu1 }
  0xd9   : > { %v873_v18 = vpop.f32.mrf.mxu1 }
  0xdb   : > { %v400_v19 = vpop.f32.mrf.mxu1 }
  0xdd   : > { %v874_v20 = vpop.f32.mrf.mxu1 }
  0xdf   : > { %v447_v21 = vpop.f32.mrf.mxu1 }
  0xe0   : > { %v448_v22 = vadd.f32 %v447_v21, %v397_v17 }
  0xe1   : > { %v879_v24 = vpop.f32.mrf.mxu1 }
  0xe2   : > { %v461_v26 = vadd.f32 %v826_v23, %v448_v22 }
  0xe3   : > { %v450_v25 = vpop.f32.mrf.mxu1 }
  0xe4   : > { %v451_v27 = vadd.f32 %v450_v25, %v400_v19  ;;  %v463_v30 = vmax.f32 %v461_v26, 0.0 }
  0xe5   : > { %v880_v28 = vpop.f32.mrf.mxu1 }
  0xe6   : > { %v462_v29 = vadd.f32 %v826_v23, %v451_v27 }
  0xe8   : > { %v464_v31 = vmax.f32 %v462_v29, 0.0 }
  0xea   : > { %v465_v32 = vpack.c.bf16 %v464_v31, %v463_v30 }
  0xec   : > { %898 = vmatmul.mubr.bf16.vlgmr.msra.gmra.mxu0 %v465_v32 }
 0x1ac   : > { %v571_v34 = vpop.f32.mrf.mxu0 }
 0x1ad   : > { %v572_v35 = vadd.f32 %v827_v33, %v571_v34 }
 0x1ae   : > { %v899_v36 = vpop.f32.mrf.mxu0 }
 0x1af   : > { %579 = vst.msk [vmem:[%s1211_s13] sm:$0xff] %vm578_vm2, %v572_v35  ;;  %587 = sbr.rel (!%p1156_p4) target bundleno = 475 (0x1db), region = 52 }
 0x1b0   : > { %v574_v37 = vpop.f32.mrf.mxu0 }
 0x1b1   : > { %v575_v38 = vadd.f32 %v827_v33, %v574_v37 }
 0x1b2   : > { %v900_v39 = vpop.f32.mrf.mxu0 }
 0x1b3   : > { %580 = vst.msk [vmem:[%s1211_s13 + $0x8] sm:$0xff] %vm578_vm2, %v575_v38 }
 0x1b4   : > { %s1269_s24 = smov (!%p590_p8, %s589_s24), 2 }
 0x1b5   : > { %s838_s18 = sshll.u32 %s1269_s24, 7 }
 0x1b6   : > { %p841_p9 = scmp.eq.s32.totalorder %s838_s18, 0 }
 0x1b7   : > { %s1228_s19 = sshrl.u32 (!%p841_p9), %s1269_s24, 1 }
 0x1b8   : > { %598 = sbr.rel (%p841_p9) target bundleno = 475 (0x1db), region = 56  ;;  %p842_p10 = scmp.le.s32.totalorder (!%p841_p9), %s1228_s19, 0 }
 0x1bd   : > { %763 = sbr.rel (%p842_p10) target bundleno = 458 (0x1ca), region = 135  ;;  %s1057_s27 = smov (!%p842_p10), %s1222_s17  }
 0x1be   : > { %s1061_s9 = smov (!%p842_p10), %s1211_s13   ;;  %s1065_s12 = smov (!%p842_p10), 0  }
 0x1bf   : > { %s1069_s20 = smov (!%p842_p10), 0  }
 0x1c2 LB: >> { %v663_v40 = vld [vmem:[%s1063_s9] sm:$0xff]  ;;  %v665_v41 = vld [vmem:[%s1063_s9 + $0x8] sm:$0xff]  ;;  %s667_s21 = sadd.s32 1, %s1067_s12  ;;  %s657_s20 = sadd.s32 1, %s1071_s20   ;;  %s1071_s20 = sphi %s1069_s20, %s657_s20   ;;  %s1067_s12 = sphi %s1065_s12, %s1066_s12   ;;  %s1063_s9 = sphi %s1061_s9, %s672_s9   ;;  %s1059_s27 = sphi %s1057_s27, %s673_s27  }
 0x1c3   : >> { %664 = vst [vmem:[%s1059_s27] sm:$0xff] %v663_v40  ;;  %666 = vst [vmem:[%s1059_s27 + $0x8] sm:$0xff] %v665_v41  ;;  %p668_p11 = scmp.ge.s32.totalorder %s667_s21, %s1228_s19  ;;  %p656_p12 = scmp.ge.s32.totalorder %s657_s20, %s1228_s19 }
 0x1c5   : >> { %s1271_s21 = smov (%p668_p11, %s667_s21), 0  ;;  %659 = sbr.rel (!%p656_p12) target bundleno = 450 (0x1c2), region = 141 }
 0x1c6   : >> { %s843_s22 = sshll.u32 %s1271_s21, 4  ;;  %s1066_s12 = smov %s1271_s21  }
 0x1c7   : >> { %s672_s9 = scalar_lea.vmem %s1211_s13, %s843_s22 [#allocation2]   ;;  %s673_s27 = scalar_lea.vmem %s1222_s17, %s843_s22  }
 0x1ca PF: > { %s1238_s23 = sand.u32 1, %s1269_s24   ;;  %s854_s26 = sshll.u32 %s1228_s19, 4 }
 0x1cb   : > { %s678_s29 = scalar_lea.vmem %s1211_s13, %s854_s26 [#allocation2]   ;;  %s680_s30 = scalar_lea.vmem %s1222_s17, %s854_s26  }
 0x1cc   : > { %p848_p13 = scmp.le.s32.totalorder %s1238_s23, 0 }
 0x1cd   : > { %s1073_s10 = smov (!%p848_p13), %s680_s30   ;;  %s1077_s11 = smov (!%p848_p13), %s678_s29  }
 0x1ce   : > { %777 = sbr.rel (%p848_p13) target bundleno = 475 (0x1db), region = 146  ;;  %s1081_s14 = smov (!%p848_p13), 0  }
 0x1cf   : > { %s1085_s15 = smov (!%p848_p13), 0  }
 0x1d3 LB: >> { %v690_v42 = vld [vmem:[%s1079_s11] sm:$0xff]  ;;  %s692_s24 = sadd.s32 1, %s1083_s14  ;;  %s684_s15 = sadd.s32 1, %s1087_s15   ;;  %s1087_s15 = sphi %s1085_s15, %s684_s15   ;;  %s1083_s14 = sphi %s1081_s14, %s1082_s14   ;;  %s1079_s11 = sphi %s1077_s11, %s697_s11   ;;  %s1075_s10 = sphi %s1073_s10, %s698_s10  }
 0x1d4   : >> { %691 = vst [vmem:[%s1075_s10] sm:$0xff] %v690_v42  ;;  %p693_p0 = scmp.ge.s32.totalorder %s692_s24, %s1238_s23  ;;  %p683_p1 = scmp.ge.s32.totalorder %s684_s15, %s1238_s23 }
 0x1d6   : >> { %s1273_s24 = smov (%p693_p0, %s692_s24), 0  ;;  %686 = sbr.rel (!%p683_p1) target bundleno = 467 (0x1d3), region = 152 }
 0x1d7   : >> { %s849_s13 = sshll.u32 %s1273_s24, 3  ;;  %s1082_s14 = smov %s1273_s24  }
 0x1d8   : >> { %s697_s11 = scalar_lea.vmem %s678_s29, %s849_s13 [#allocation2]   ;;  %s698_s10 = scalar_lea.vmem %s680_s30, %s849_s13  }
 0x1db PF: > { %p14_p2 = scmp.ge.s32.totalorder %s1146_s28, 5   ;;  %s1265_s24 = smov %s1051_s25 }
 0x1dc   : > { %s1266_s25 = smov %s1154_s8  ;;  %s1267_s26 = smov %s1146_s28 }
 0x1dd   :  { %16 = sbr.rel (!%p14_p2) target bundleno = 2 (0x2), region = 163 }

</bundles_post_ra>
